<compile_context>
chip_gen: v5e
topology: v5e:2x2
jax: 0.10.0
libtpu: 0.0.40
codegen_flags: <defaults>
</compile_context>

<pallas_src>
import jax
import jax.numpy as jnp
from jax.experimental import pallas as pl
from jax.experimental.pallas import tpu as pltpu

IN_CHANNELS = 13
HIDDEN = 64
OUT_CHANNELS = 3


def _round_up(x, m):
    return ((x + m - 1) // m) * m


def _msi_kernel(x_ref, w1_ref, b1_ref, w2_ref, b2_ref, o_ref):
    # x_ref : (13, TM)    channel-major spatial tile (f32)
    # w1_ref: (64, 13)    Conv2d(13->64, k=1) weight (f32)
    # b1_ref: (64, 1)     (f32)
    # w2_ref: (3, 64)     Conv2d(64->3, k=1) weight (bf16 by default, or f32)
    # b2_ref: (3, 1)      (f32)
    # o_ref : (3, TM)     (f32)
    h = jnp.dot(w1_ref[...], x_ref[...], preferred_element_type=jnp.float32)
    # Bias + ReLU in f32 (portable across v5e/v6e/v7x), then cast the hidden
    # activation to the second-layer weight dtype (bf16 by default): this
    # halves the layer-2 MXU pushes and the h spill/reload on the vst/vld slots.
    h = jnp.maximum(h + b1_ref[...], 0.0).astype(w2_ref.dtype)
    y = jnp.dot(w2_ref[...], h, preferred_element_type=jnp.float32)
    y = jnp.maximum(y + b2_ref[...], 0.0)
    o_ref[...] = y.astype(o_ref.dtype)


def _choose_tm(batch, spatial, hidden_bytes):
    # Large lane-aligned tiles amortize the ~0.35 us/step pipeline overhead.
    # With a bf16 hidden activation we can afford 32768-lane tiles; keep the
    # shrink rule loose (only need a few steps to fill the pipeline / the two
    # v7x TensorCores).
    tm = 32768 if hidden_bytes <= 2 else 16384
    while tm > 512 and batch * pl.cdiv(spatial, tm) < 4:
        tm //= 2
    tm = min(tm, _round_up(spatial, 128))
    return max(tm, 128)


def _vmem_limit_bytes(tm, hidden_bytes):
    # Per-step footprint (sublane-padded):
    #   input  tile : 16 sublanes x tm x 4 B, double-buffered
    #   output tile :  8 sublanes x tm x 4 B, double-buffered
    #   hidden h    : 64 x tm x hidden_bytes (compiler scratch, plus epilogue
    #                 temporaries -> budget ~2x)
    in_tile = 16 * tm * 4
    out_tile = 8 * tm * 4
    h_scratch = HIDDEN * tm * hidden_bytes
    est = 2 * (in_tile + out_tile) + 2 * h_scratch + (1 << 20)
    # Leave headroom, but stay well under v7x's 64 MiB physical VMEM.
    return int(min(max(2 * est, 32 << 20), 48 << 20))


def msi_embedder2_forward(x_nchw, w1, b1, w2, b2, *, tm=None,
                          hidden_dtype=jnp.bfloat16):
    """x_nchw: (B, 13, H, W) float32.  Returns (B, 3, H, W) float32.

    w1: (64, 13)  == nn.Conv2d(13, 64, 1).weight[:, :, 0, 0]
    b1: (64,)
    w2: (3, 64)   == nn.Conv2d(64, 3, 1).weight[:, :, 0, 0]
    b2: (3,)
    hidden_dtype: dtype of the hidden activation / second-layer weight inside
        the kernel (jnp.bfloat16 default for speed; jnp.float32 for exactness).
    """
    B, C, H, W = x_nchw.shape
    assert C == IN_CHANNELS
    S = H * W

    hidden_bytes = jnp.dtype(hidden_dtype).itemsize
    if tm is None:
        tm = _choose_tm(B, S, hidden_bytes)
    assert tm % 128 == 0, "spatial tile must be lane-aligned (multiple of 128)"

    # Channel-major flatten: (B, 13, S).  Pure reshape, no transpose, no pad.
    x_flat = jnp.asarray(x_nchw, jnp.float32).reshape(B, C, S)

    w1_m = jnp.asarray(w1, jnp.float32)                           # (64, 13)
    b1_m = jnp.asarray(b1, jnp.float32).reshape(HIDDEN, 1)        # (64, 1)
    w2_m = jnp.asarray(w2, jnp.float32).astype(hidden_dtype)      # (3, 64)
    b2_m = jnp.asarray(b2, jnp.float32).reshape(OUT_CHANNELS, 1)  # (3, 1)

    grid = (B, pl.cdiv(S, tm))

    flops = 2 * B * S * (IN_CHANNELS * HIDDEN + HIDDEN * OUT_CHANNELS)
    bytes_accessed = 4 * (
        B * S * (IN_CHANNELS + OUT_CHANNELS)
        + HIDDEN * IN_CHANNELS + HIDDEN
        + OUT_CHANNELS * HIDDEN + OUT_CHANNELS
    )

    out_flat = pl.pallas_call(
        _msi_kernel,
        out_shape=jax.ShapeDtypeStruct((B, OUT_CHANNELS, S), jnp.float32),
        grid_spec=pltpu.PrefetchScalarGridSpec(
            num_scalar_prefetch=0,
            grid=grid,
            in_specs=[
                # batch dim squeezed out of the kernel ref (None -> Squeezed)
                pl.BlockSpec((None, IN_CHANNELS, tm), lambda b, i: (b, 0, i)),
                pl.BlockSpec((HIDDEN, IN_CHANNELS), lambda b, i: (0, 0)),
                pl.BlockSpec((HIDDEN, 1), lambda b, i: (0, 0)),
                pl.BlockSpec((OUT_CHANNELS, HIDDEN), lambda b, i: (0, 0)),
                pl.BlockSpec((OUT_CHANNELS, 1), lambda b, i: (0, 0)),
            ],
            out_specs=pl.BlockSpec((None, OUT_CHANNELS, tm), lambda b, i: (b, 0, i)),
        ),
        compiler_params=pltpu.CompilerParams(
            dimension_semantics=("parallel", "parallel"),
            vmem_limit_bytes=_vmem_limit_bytes(tm, hidden_bytes),
        ),
        cost_estimate=pl.CostEstimate(
            flops=flops, transcendentals=0, bytes_accessed=bytes_accessed
        ),
    )(x_flat, w1_m, b1_m, w2_m, b2_m)

    # (B, 3, S) -> (B, 3, H, W): pure reshape, already NCHW.
    return out_flat.reshape(B, OUT_CHANNELS, H, W)


def _reference_forward(x_nchw, w1, b1, w2, b2):
    # pure-JAX reference of the two 1x1 convs + ReLUs (for sanity check)
    x = jnp.transpose(x_nchw, (0, 2, 3, 1))                       # NHWC
    h = jnp.maximum(jnp.einsum("bhwc,oc->bhwo", x, w1) + b1, 0.0)
    y = jnp.maximum(jnp.einsum("bhwc,oc->bhwo", h, w2) + b2, 0.0)
    return jnp.transpose(y, (0, 3, 1, 2))                         # NCHW


if __name__ == "__main__":
    key = jax.random.PRNGKey(0)
    k_x, k_w1, k_b1, k_w2, k_b2 = jax.random.split(key, 5)

    # Small example consistent with the module: batch=2, 13 channels, 16x16.
    B, H, W = 2, 16, 16
    x = jax.random.normal(k_x, (B, IN_CHANNELS, H, W), dtype=jnp.float32)

    # Deterministic synthetic parameters (same shapes as nn.Conv2d k=1 weights).
    w1 = 0.1 * jax.random.normal(k_w1, (HIDDEN, IN_CHANNELS), dtype=jnp.float32)
    b1 = 0.1 * jax.random.normal(k_b1, (HIDDEN,), dtype=jnp.float32)
    w2 = 0.1 * jax.random.normal(k_w2, (OUT_CHANNELS, HIDDEN), dtype=jnp.float32)
    b2 = 0.1 * jax.random.normal(k_b2, (OUT_CHANNELS,), dtype=jnp.float32)

    ref = _reference_forward(x, w1, b1, w2, b2)

    # Exact-mode (f32 hidden) run: must match the f32 reference tightly.
    out_f32 = msi_embedder2_forward(x, w1, b1, w2, b2, hidden_dtype=jnp.float32)
    out_f32 = jax.block_until_ready(out_f32)
    assert out_f32.shape == (B, OUT_CHANNELS, H, W), out_f32.shape
    assert jnp.allclose(out_f32, ref, atol=1e-5, rtol=1e-5), "f32 mode mismatch"

    # Fast-mode (bf16 hidden activation + bf16 second-layer weight) run:
    # numerics differ slightly from the f32 reference -> looser tolerance.
    out = msi_embedder2_forward(x, w1, b1, w2, b2)
    out = jax.block_until_ready(out)
    assert out.shape == (B, OUT_CHANNELS, H, W), out.shape
    assert jnp.allclose(out, ref, atol=2e-2, rtol=2e-2), "bf16 mode mismatch"

    print("KERNEL_OK")
</pallas_src>

<mosaic_0001>
module attributes {stable_mosaic.version = 11 : i64} {
  func.func @_msi_kernel(%arg0: i32, %arg1: i32, %arg2: memref<1x13x256xf32, #tpu.memory_space<vmem>>, %arg3: memref<64x13xf32, #tpu.memory_space<vmem>>, %arg4: memref<64x1xf32, #tpu.memory_space<vmem>>, %arg5: memref<3x64xf32, #tpu.memory_space<vmem>>, %arg6: memref<3x1xf32, #tpu.memory_space<vmem>>, %arg7: memref<1x3x256xf32, #tpu.memory_space<vmem>>) attributes {dimension_semantics = [#tpu.dimension_semantics<parallel>, #tpu.dimension_semantics<parallel>], iteration_bounds = array<i64: 2, 1>, scalar_prefetch = 0 : i64, scratch_operands = 0 : i64, tpu.core_type = #tpu.core_type<tc>, window_params = [{transform_indices = @transform_0, window_bounds = array<i64: 1, 13, 256>}, {pipeline_mode = #tpu.pipeline_mode<synchronous>, transform_indices = @transform_1, window_bounds = array<i64: 64, 13>}, {pipeline_mode = #tpu.pipeline_mode<synchronous>, transform_indices = @transform_2, window_bounds = array<i64: 64, 1>}, {pipeline_mode = #tpu.pipeline_mode<synchronous>, transform_indices = @transform_3, window_bounds = array<i64: 3, 64>}, {pipeline_mode = #tpu.pipeline_mode<synchronous>, transform_indices = @transform_4, window_bounds = array<i64: 3, 1>}, {transform_indices = @transform_5, window_bounds = array<i64: 1, 3, 256>}]} {
    %c0 = arith.constant 0 : index
    %c0_0 = arith.constant 0 : index
    %0 = vector.load %arg3[%c0, %c0_0] : memref<64x13xf32, #tpu.memory_space<vmem>>, vector<64x13xf32>
    %c0_1 = arith.constant 0 : index
    %c0_2 = arith.constant 0 : index
    %c0_3 = arith.constant 0 : index
    %1 = vector.load %arg2[%c0_1, %c0_2, %c0_3] : memref<1x13x256xf32, #tpu.memory_space<vmem>>, vector<1x13x256xf32>
    %2 = vector.shape_cast %1 : vector<1x13x256xf32> to vector<13x256xf32>
    %cst = arith.constant dense<0.000000e+00> : vector<64x256xf32>
    %3 = tpu.matmul %0, %2, %cst {dimension_numbers = #tpu.dot_dimension_numbers<[1], [0], [0], [1], [0, 0, 1, 1], [], []>} : vector<64x13xf32>, vector<13x256xf32>, vector<64x256xf32> -> vector<64x256xf32>
    %c0_4 = arith.constant 0 : index
    %c0_5 = arith.constant 0 : index
    %4 = vector.load %arg4[%c0_4, %c0_5] : memref<64x1xf32, #tpu.memory_space<vmem>>, vector<64x1xf32>
    %5 = vector.broadcast %4 : vector<64x1xf32> to vector<64x256xf32>
    %6 = arith.addf %3, %5 : vector<64x256xf32>
    %cst_6 = arith.constant 0.000000e+00 : f32
    %7 = vector.broadcast %cst_6 : f32 to vector<64x256xf32>
    %8 = arith.maximumf %6, %7 : vector<64x256xf32>
    %c0_7 = arith.constant 0 : index
    %c0_8 = arith.constant 0 : index
    %9 = vector.load %arg5[%c0_7, %c0_8] : memref<3x64xf32, #tpu.memory_space<vmem>>, vector<3x64xf32>
    %cst_9 = arith.constant dense<0.000000e+00> : vector<3x256xf32>
    %10 = tpu.matmul %9, %8, %cst_9 {dimension_numbers = #tpu.dot_dimension_numbers<[1], [0], [0], [1], [0, 0, 1, 1], [], []>} : vector<3x64xf32>, vector<64x256xf32>, vector<3x256xf32> -> vector<3x256xf32>
    %c0_10 = arith.constant 0 : index
    %c0_11 = arith.constant 0 : index
    %11 = vector.load %arg6[%c0_10, %c0_11] : memref<3x1xf32, #tpu.memory_space<vmem>>, vector<3x1xf32>
    %12 = vector.broadcast %11 : vector<3x1xf32> to vector<3x256xf32>
    %13 = arith.addf %10, %12 : vector<3x256xf32>
    %cst_12 = arith.constant 0.000000e+00 : f32
    %14 = vector.broadcast %cst_12 : f32 to vector<3x256xf32>
    %15 = arith.maximumf %13, %14 : vector<3x256xf32>
    %c0_13 = arith.constant 0 : index
    %c0_14 = arith.constant 0 : index
    %c0_15 = arith.constant 0 : index
    %16 = vector.load %arg7[%c0_13, %c0_14, %c0_15] : memref<1x3x256xf32, #tpu.memory_space<vmem>>, vector<1x3x256xf32>
    %17 = vector.shape_cast %16 : vector<1x3x256xf32> to vector<3x256xf32>
    %18 = vector.shape_cast %15 : vector<3x256xf32> to vector<1x3x256xf32>
    tpu.vector_store %arg7[%c0_13, %c0_14, %c0_15], %18 {strides = array<i32>} : memref<1x3x256xf32, #tpu.memory_space<vmem>>, vector<1x3x256xf32>,
    return
  }
  func.func @transform_0(%arg0: i32, %arg1: i32) -> (i32, i32, i32) {
    %c0_i32 = arith.constant 0 : i32
    %c0_i32_0 = arith.constant 0 : i32
    return %arg0, %c0_i32, %arg1 : i32, i32, i32
  }
  func.func @transform_1(%arg0: i32, %arg1: i32) -> (i32, i32) {
    %c0_i32 = arith.constant 0 : i32
    %c0_i32_0 = arith.constant 0 : i32
    %c0_i32_1 = arith.constant 0 : i32
    return %c0_i32, %c0_i32_0 : i32, i32
  }
  func.func @transform_2(%arg0: i32, %arg1: i32) -> (i32, i32) {
    %c0_i32 = arith.constant 0 : i32
    %c0_i32_0 = arith.constant 0 : i32
    %c0_i32_1 = arith.constant 0 : i32
    return %c0_i32, %c0_i32_0 : i32, i32
  }
  func.func @transform_3(%arg0: i32, %arg1: i32) -> (i32, i32) {
    %c0_i32 = arith.constant 0 : i32
    %c0_i32_0 = arith.constant 0 : i32
    %c0_i32_1 = arith.constant 0 : i32
    return %c0_i32, %c0_i32_0 : i32, i32
  }
  func.func @transform_4(%arg0: i32, %arg1: i32) -> (i32, i32) {
    %c0_i32 = arith.constant 0 : i32
    %c0_i32_0 = arith.constant 0 : i32
    %c0_i32_1 = arith.constant 0 : i32
    return %c0_i32, %c0_i32_0 : i32, i32
  }
  func.func @transform_5(%arg0: i32, %arg1: i32) -> (i32, i32, i32) {
    %c0_i32 = arith.constant 0 : i32
    %c0_i32_0 = arith.constant 0 : i32
    return %arg0, %c0_i32, %arg1 : i32, i32, i32
  }
}

</mosaic_0001>

<bundles_post_ra>
// kernel: tpu_custom_call.1
= control target key start
LH: loop header
LB: loop body
LE: loop exit
PB: predicated region body
PF: predicated region fallthrough
CT: control target
= control target key end

     0   :  { %s721_s18 = smov 0   ;;  %s723_s19 = smov 0   ;;  %s828_s0 = inlined_call_operand.vmem [shape: f32[2,13,256], index: 0, kind: input, shape index: {}]   ;;  %s829_s1 = inlined_call_operand.vmem [shape: f32[64,13], index: 1, kind: input, shape index: {}]   ;;  %s830_s2 = inlined_call_operand.vmem [shape: f32[64,1], index: 2, kind: input, shape index: {}]   ;;  %s831_s3 = inlined_call_operand.vmem [shape: f32[3,64], index: 3, kind: input, shape index: {}]   ;;  %s832_s4 = inlined_call_operand.vmem [shape: f32[3,1], index: 4, kind: input, shape index: {}]   ;;  %s833_s5 = inlined_call_operand.vmem [shape: f32[2,3,256], index: 5, kind: output, shape index: {}]  }
   0x1   :  { %s725_s20 = smov 0  }
   0x2 LB: > { %s27_s21 = sadd.s32 1, %s684_s19  ;;  %p605_p0 = scmp.ge.s32.totalorder %s688_s20, 1  ;;  %s688_s20 = sphi %s725_s20, %s15_s20   ;;  %s684_s19 = sphi %s723_s19, %s835_s19   ;;  %s680_s18 = sphi %s721_s18, %s834_s18  }
   0x3   : > { %p29_p1 = scmp.ge.s32.totalorder %s27_s21, 2  ;;  %p208_p2 = scmp.lt.s32.totalorder %s688_s20, 3 }
   0x5   : > { %s837_s21 = smov (%p29_p1, %s27_s21), 0  ;;  %p209_p3 = pnand %p605_p0, %p208_p2 }
   0x6   : > { %p245_p4 = scmp.lt.s32.totalorder (!%p209_p3), %s680_s18, 1 }
   0x7   : > { %212 = sbr.rel (%p209_p3) target bundleno = 332 (0x14c), region = 40 }
   0xc   : > { %v281_v0 = vld [vmem:[%s830_s2 + $0x28] sm:$0xff]  ;;  %v690_v1 = vmov 0   ;;  %v283_v2 = vld [vmem:[%s830_s2 + $0x38] sm:$0xff]  ;;  %s839_s18 = smov (!%p245_p4, %s680_s18), 1  ;;  %vm349_vm0 = vcmask 1044480   ;;  %v264_v7 = vld [vmem:[%s829_s1] sm:$0xff] }
   0xd   : > { %664 = vset.pattern.permute.xlu1 %v690_v1  ;;  %663 = vset.pattern.permute.xlu0 %v690_v1  ;;  %s632_s26 = sshll.u32 %s839_s18, 5  ;;  %vm324_vm1 = vcmask 105472   ;;  %v269_v8 = vld [vmem:[%s829_s1 + $0x28] sm:$0xff]  ;;  %v280_v9 = vld [vmem:[%s830_s2 + $0x20] sm:$0xff]  ;;  %v282_v10 = vld [vmem:[%s830_s2 + $0x30] sm:$0xff]  ;;  %vm461_vm2 = vcmask 523264  }
   0xe   : > { %311 = vperm.xlu1 %664, %v281_v0   ;;  %321 = vperm.xlu0 %663, %v283_v2   ;;  %s252_s29 = scalar_lea.vmem %s828_s0, %s632_s26  ;;  %v279_v11 = vld [vmem:[%s830_s2 + $0x18] sm:$0xff]  ;;  %v265_v12 = vld [vmem:[%s829_s1 + $0x8] sm:$0xff]  ;;  %v270_v13 = vld [vmem:[%s829_s1 + $0x30] sm:$0xff]  ;;  %s633_s16 = sshll.u32 %s839_s18, 3  ;;  %vm510_vm3 = vcmask 1043456  }
   0xf   : > { %665 = vset.pattern.permute.xlu2 %v690_v1  ;;  %v274_v3 = vld [vmem:[%s252_s29 + $0x10] sm:$0x1f]  ;;  %v275_v4 = vld [vmem:[%s252_s29 + $0x18] sm:$0x1f]  ;;  %v272_v5 = vld [vmem:[%s252_s29] sm:$0xff]  ;;  %s262_s23 = scalar_lea.vmem %s833_s5, %s633_s16 }
  0x10   : > { %610 = vmatpush.msk.msra.mxu0 %vm349_vm0, %v274_v3  ;;  %634 = vmatpush.msk.msra.mxu2 %vm349_vm0, %v274_v3  ;;  %v273_v6 = vld [vmem:[%s252_s29 + $0x8] sm:$0xff]  ;;  %v276_v14 = vld [vmem:[%s830_s2] sm:$0xff]  ;;  %v278_v16 = vld [vmem:[%s830_s2 + $0x10] sm:$0xff] }
  0x11   : > { %619 = vmatpush.msk.msra.mxu1 %vm349_vm0, %v275_v4  ;;  %636 = vmatpush.msk.msra.mxu3 %vm349_vm0, %v275_v4  ;;  %v277_v15 = vld [vmem:[%s830_s2 + $0x8] sm:$0xff]  ;;  %v266_v17 = vld [vmem:[%s829_s1 + $0x10] sm:$0xff]  ;;  %v271_v18 = vld [vmem:[%s829_s1 + $0x38] sm:$0xff] }
  0x12   : > { %371 = vmatpush.msra.mxu0 %v272_v5  ;;  %635 = vmatpush.msra.mxu2 %v272_v5  ;;  %v455_v19 = vld [vmem:[%s832_s4] sm:$0x7]  ;;  %v267_v20 = vld [vmem:[%s829_s1 + $0x18] sm:$0xff] }
  0x13   : > { %412 = vmatpush.msra.mxu1 %v273_v6  ;;  %637 = vmatpush.msra.mxu3 %v273_v6  ;;  %v268_v21 = vld [vmem:[%s829_s1 + $0x20] sm:$0xff] }
  0x14   : > { %611 = vmatmul.msk.f32.vlgmr.msra.gmra.mxu0 %vm324_vm1, %v264_v7  ;;  %616 = vmatmul.msk.f32.vlgmr.msra.gmra.mxu2 %vm324_vm1, %v269_v8 }
  0x15   : > { %620 = vmatmul.msk.f32.vlgmr.msra.gmra.mxu1 %vm324_vm1, %v264_v7  ;;  %625 = vmatmul.msk.f32.vlgmr.msra.gmra.mxu3 %vm324_vm1, %v269_v8 }
  0x16   : > { %306 = vperm.xlu1 %664, %v280_v9   ;;  %316 = vperm.xlu0 %663, %v282_v10  }
  0x17   : > { %301 = vperm.xlu2 %665, %v279_v11  }
  0x1c   : > { %612 = vmatmul.msk.f32.gmra.mxu0 %vm324_vm1, %v265_v12  ;;  %617 = vmatmul.msk.f32.gmra.mxu2 %vm324_vm1, %v270_v13 }
  0x1d   : > { %621 = vmatmul.msk.f32.gmra.mxu1 %vm324_vm1, %v265_v12  ;;  %626 = vmatmul.msk.f32.gmra.mxu3 %vm324_vm1, %v270_v13  ;;  %v454_v13 = vld [vmem:[%s831_s3] sm:$0x7] }
  0x1e   : > { %286 = vperm.xlu1 %664, %v276_v14   ;;  %291 = vperm.xlu0 %663, %v277_v15  }
  0x1f   : > { %296 = vperm.xlu2 %665, %v278_v16  }
  0x24   : > { %613 = vmatmul.msk.f32.gmra.mxu0 %vm324_vm1, %v266_v17  ;;  %618 = vmatmul.msk.f32.gmra.mxu2 %vm324_vm1, %v271_v18 }
  0x25   : > { %622 = vmatmul.msk.f32.gmra.mxu1 %vm324_vm1, %v266_v17  ;;  %627 = vmatmul.msk.f32.gmra.mxu3 %vm324_vm1, %v271_v18 }
  0x27   : > { %458 = vperm.xlu2 %665, %v455_v19  }
  0x2c   : > { %614 = vmatmul.msk.f32.gmra.mxu0 %vm324_vm1, %v267_v20 }
  0x2d   : > { %623 = vmatmul.msk.f32.gmra.mxu1 %vm324_vm1, %v267_v20 }
  0x34   : > { %615 = vmatmul.msk.f32.gmra.mxu0 %vm324_vm1, %v268_v21 }
  0x35   : > { %624 = vmatmul.msk.f32.gmra.mxu1 %vm324_vm1, %v268_v21 }
  0x71   : > { %v302_v36 = vpop.permute.xlu2 %301 }
  0x79   : > { %v297_v54 = vpop.permute.xlu2 %296 }
  0x80   : > { %v322_v28 = vpop.permute.xlu0 %321  ;;  %v312_v32 = vpop.permute.xlu1 %311 }
  0x81   : > { %v459_v16 = vpop.permute.xlu2 %458 }
  0x88   : > { %v317_v34 = vpop.permute.xlu0 %316  ;;  %v307_v48 = vpop.permute.xlu1 %306 }
  0x90   : > { %v292_v60 = vpop.permute.xlu0 %291  ;;  %v287_v1 = vpop.permute.xlu1 %286 }
  0x91   : > { %v373_v22 = vpop.f32.mrf.mxu0 }
  0x92   : > { %v414_v23 = vpop.f32.mrf.mxu1  ;;  %v374_v6 = vadd.f32 %v373_v22, %v287_v1 }
  0x93   : > { %v415_v8 = vadd.f32 %v414_v23, %v287_v1 }
  0x94   : > { %v438_v12 = vmax.f32 %v374_v6, 0.0 }
  0x95   : > { %v439_v14 = vmax.f32 %v415_v8, 0.0 }
  0x97   : > { %v388_v24 = vpop.f32.mrf.mxu2 }
  0x98   : > { %v429_v25 = vpop.f32.mrf.mxu3  ;;  %v389_v43 = vadd.f32 %v388_v24, %v312_v32 }
  0x99   : > { %v376_v26 = vpop.f32.mrf.mxu0  ;;  %v430_v46 = vadd.f32 %v429_v25, %v312_v32 }
  0x9a   : > { %v417_v27 = vpop.f32.mrf.mxu1  ;;  %v448_v51 = vmax.f32 %v389_v43, 0.0  ;;  %v377_v2 = vadd.f32 %v376_v26, %v292_v60 }
  0x9b   : > { %v449_v52 = vmax.f32 %v430_v46, 0.0  ;;  %v418_v4 = vadd.f32 %v417_v27, %v292_v60 }
  0x9c   : > { %v440_v10 = vmax.f32 %v377_v2, 0.0 }
  0x9d   : > { %v441_v11 = vmax.f32 %v418_v4, 0.0 }
  0x9f   : > { %v391_v29 = vpop.f32.mrf.mxu2 }
  0xa0   : > { %v432_v30 = vpop.f32.mrf.mxu3  ;;  %v392_v37 = vadd.f32 %v391_v29, %v317_v34 }
  0xa1   : > { %v379_v31 = vpop.f32.mrf.mxu0  ;;  %v433_v40 = vadd.f32 %v432_v30, %v317_v34 }
  0xa2   : > { %v420_v33 = vpop.f32.mrf.mxu1  ;;  %v450_v49 = vmax.f32 %v392_v37, 0.0  ;;  %v380_v61 = vadd.f32 %v379_v31, %v297_v54 }
  0xa3   : > { %v451_v50 = vmax.f32 %v433_v40, 0.0  ;;  %v421_v63 = vadd.f32 %v420_v33, %v297_v54 }
  0xa4   : > { %v442_v7 = vmax.f32 %v380_v61, 0.0 }
  0xa5   : > { %v443_v9 = vmax.f32 %v421_v63, 0.0 }
  0xa7   : > { %v394_v35 = vpop.f32.mrf.mxu2 }
  0xa8   : > { %v395_v38 = vadd.f32 %v394_v35, %v322_v28  ;;  %v435_v39 = vpop.f32.mrf.mxu3 }
  0xa9   : > { %v436_v41 = vadd.f32 %v435_v39, %v322_v28  ;;  %v382_v42 = vpop.f32.mrf.mxu0 }
  0xaa   : > { %v452_v44 = vmax.f32 %v395_v38, 0.0  ;;  %v423_v45 = vpop.f32.mrf.mxu1  ;;  %v383_v55 = vadd.f32 %v382_v42, %v302_v36 }
  0xab   : > { %v453_v47 = vmax.f32 %v436_v41, 0.0  ;;  %v424_v58 = vadd.f32 %v423_v45, %v302_v36 }
  0xac   : > { %473 = vmatpush.msrb.mxu2 %v452_v44  ;;  %v444_v3 = vmax.f32 %v383_v55, 0.0 }
  0xad   : > { %493 = vmatpush.msrb.mxu3 %v453_v47  ;;  %v445_v5 = vmax.f32 %v424_v58, 0.0 }
  0xae   : > { %474 = vmatpush.msrb.mxu2 %v450_v49 }
  0xaf   : > { %494 = vmatpush.msrb.mxu3 %v451_v50 }
  0xb0   : > { %475 = vmatpush.msrb.mxu2 %v448_v51 }
  0xb1   : > { %495 = vmatpush.msrb.mxu3 %v449_v52  ;;  %v385_v53 = vpop.f32.mrf.mxu0 }
  0xb2   : > { %v386_v56 = vadd.f32 %v385_v53, %v307_v48  ;;  %v426_v57 = vpop.f32.mrf.mxu1 }
  0xb3   : > { %v427_v59 = vadd.f32 %v426_v57, %v307_v48 }
  0xb4   : > { %v446_v62 = vmax.f32 %v386_v56, 0.0 }
  0xb5   : > { %v447_v0 = vmax.f32 %v427_v59, 0.0 }
  0xb6   : > { %476 = vmatpush.msrb.mxu2 %v446_v62 }
  0xb7   : > { %496 = vmatpush.msrb.mxu3 %v447_v0 }
  0xb8   : > { %477 = vmatpush.msrb.mxu2 %v444_v3 }
  0xb9   : > { %497 = vmatpush.msrb.mxu3 %v445_v5 }
  0xba   : > { %478 = vmatpush.msrb.mxu2 %v442_v7 }
  0xbb   : > { %498 = vmatpush.msrb.mxu3 %v443_v9 }
  0xbc   : > { %479 = vmatpush.msrb.mxu2 %v440_v10 }
  0xbd   : > { %499 = vmatpush.msrb.mxu3 %v441_v11 }
  0xbe   : > { %480 = vmatpush.msrb.mxu2 %v438_v12 }
  0xbf   : > { %500 = vmatpush.msrb.mxu3 %v439_v14  ;;  %628 = vmatmul.msk.f32.vlgmr.msrb.gmra.mxu2 %vm461_vm2, %v454_v13 }
  0xc0   : > { %629 = vmatmul.msk.f32.vlgmr.msrb.gmra.mxu3 %vm461_vm2, %v454_v13 }
 0x142   : > { %v482_v15 = vpop.f32.mrf.mxu2 }
 0x143   : > { %v502_v17 = vpop.f32.mrf.mxu3  ;;  %v483_v18 = vadd.f32 %v482_v15, %v459_v16 }
 0x144   : > { %v503_v19 = vadd.f32 %v502_v17, %v459_v16 }
 0x145   : > { %v505_v21 = vmax.f32 %v483_v18, 0.0 }
 0x146   : > { %v506_v20 = vmax.f32 %v503_v19, 0.0 }
 0x148   : > { %v509_v22 = vrot.slane %v506_v20, 4 }
 0x14a   : > { %v511_v23 = vsel %vm510_vm3, %v505_v21, %v509_v22 }
 0x14b   : > { %513 = vst [vmem:[%s262_s23] sm:$0x77] %v511_v23 }
 0x14c PF: > { %s15_s20 = sadd.s32 1, %s688_s20   ;;  %s834_s18 = smov %s684_s19 }
 0x14d   : > { %p12_p5 = scmp.ge.s32.totalorder %s15_s20, 4   ;;  %s835_s19 = smov %s837_s21 }
 0x14f   :  { %14 = sbr.rel (!%p12_p5) target bundleno = 2 (0x2), region = 70 }

</bundles_post_ra>
